<compile_context>
chip_gen: v7x
topology: tpu7x:2x2x1
jax: 0.10.0
libtpu: 0.0.40
codegen_flags: <defaults>
</compile_context>

<pallas_src>
import functools

import jax
import jax.numpy as jnp
from jax.experimental import pallas as pl
from jax.experimental.pallas import tpu as pltpu


def se_kernel(x_ref, w1_ref, w2_ref, o_ref, *, inv_hw):
    # x_ref : (Bt, C, HW)  batch tile, native dtype.
    # w1_ref: (C_red, C)   PyTorch Linear weight layout (out, in)
    # w2_ref: (C, C_red)

    # Squeeze: global average pool over the lane (spatial) axis, fp32 accumulate.
    pooled = jnp.sum(x_ref[...], axis=-1, dtype=jnp.float32) * inv_hw  # (Bt, C)

    # Excitation MLP on the pooled vector (tiny; weights stay VMEM-resident,
    # MXU cost is irrelevant -- kernel is HBM-bandwidth bound). Feed weights in
    # their native dtype; preferred_element_type keeps the accumulation in f32.
    h = jnp.einsum("bc,rc->br", pooled, w1_ref[...],
                   preferred_element_type=jnp.float32)        # (Bt, C_red)
    h = jnp.maximum(h, 0.0)
    s = jnp.einsum("br,cr->bc", h, w2_ref[...],
                   preferred_element_type=jnp.float32)        # (Bt, C)
    s = jax.nn.sigmoid(s)

    # Rescale: re-read the VMEM block (don't keep the whole block live as a
    # value across the MLP); broadcast per-channel gate across lanes.
    o_ref[...] = x_ref[...] * s[:, :, None].astype(o_ref.dtype)


def _vmem_capacity_bytes():
    """Physical per-core VMEM; conservative default if the query is unavailable."""
    try:
        return int(pltpu.get_tpu_info().vmem_capacity_bytes)
    except Exception:
        return 64 << 20


def _choose_bt(B, per_b_bytes, target_bytes, min_steps, prefer_even):
    """Batch-tile size: as large as the byte target allows, but keep at least
    `min_steps` grid steps (software-pipeline steady state / megacore split),
    with an even step count preferred on 2-TensorCore chips."""
    bt = max(1, min(B, target_bytes // max(per_b_bytes, 1)))
    want_steps = min(B, max(1, min_steps))
    if bt > 1:
        bt = min(bt, max(1, B // want_steps))
    if prefer_even and bt > 1 and pl.cdiv(B, bt) % 2 == 1:
        for cand in range(bt - 1, 0, -1):
            if pl.cdiv(B, cand) % 2 == 0:
                bt = cand
                break
    return bt


def squeeze_excitation(x, w1, w2):
    """x: (B, C, H, W) NCHW. w1: (C//r, C), w2: (C, C//r). Returns NCHW."""
    B, C, H, W = x.shape
    HW = H * W
    x_flat = x.reshape(B, C, HW)          # row-major collapse: no data movement

    vmem_cap = _vmem_capacity_bytes()
    small_vmem = vmem_cap <= (64 << 20)   # v7x-class (64 MiB per TensorCore)
    if small_vmem:
        target_block_bytes = 5 << 20      # ~4-6 MiB blocks
        vmem_ceiling = 48 << 20           # leave headroom under 64 MiB physical
        min_steps, prefer_even = 8, True  # >=4 iterations per TensorCore
    else:
        target_block_bytes = 12 << 20     # 8-16 MiB blocks (v5e/v6e, 128 MiB VMEM)
        vmem_ceiling = 96 << 20
        min_steps, prefer_even = 4, False

    per_b_bytes = C * HW * x.dtype.itemsize
    Bt = _choose_bt(B, per_b_bytes, target_block_bytes, min_steps, prefer_even)
    grid = (pl.cdiv(B, Bt),)              # ragged last batch block is fine:
                                          # junk pooled rows are never stored.

    block_bytes = Bt * per_b_bytes
    w_bytes = w1.size * w1.dtype.itemsize + w2.size * w2.dtype.itemsize
    # in + out blocks, each double-buffered, plus weights and slack.
    vmem_limit = int(min(max(4 * block_bytes + 2 * w_bytes + (4 << 20), 16 << 20),
                         vmem_ceiling))

    kernel = functools.partial(se_kernel, inv_hw=1.0 / HW)

    out_flat = pl.pallas_call(
        kernel,
        out_shape=jax.ShapeDtypeStruct((B, C, HW), x.dtype),
        grid=grid,
        in_specs=[
            # Bt batch elements per grid step; (C, HW) are full extents -> no
            # lane padding required and no wrapper pad/slice HBM passes.
            pl.BlockSpec((Bt, C, HW), lambda b: (b, 0, 0)),
            # Weights: full arrays, same block every step (VMEM-resident).
            pl.BlockSpec(w1.shape, lambda b: (0, 0)),
            pl.BlockSpec(w2.shape, lambda b: (0, 0)),
        ],
        out_specs=pl.BlockSpec((Bt, C, HW), lambda b: (b, 0, 0)),
        compiler_params=pltpu.CompilerParams(
            dimension_semantics=("parallel",),
            vmem_limit_bytes=vmem_limit,
        ),
    )(x_flat, w1, w2)

    return out_flat.reshape(B, C, H, W)


def _reference(x, w1, w2):
    # Pure-JAX reference matching the PyTorch forward.
    pooled = jnp.mean(x, axis=(2, 3))                        # (B, C)
    h = jnp.maximum(pooled @ w1.T, 0.0)                      # (B, C//r)
    s = jax.nn.sigmoid(h @ w2.T)                             # (B, C)
    return x * s[:, :, None, None]


if __name__ == "__main__":
    # Small shapes consistent with the module: channel=32, reduction=16 -> hidden=2.
    B, C, H, W = 2, 32, 16, 16
    reduction = 16
    C_red = C // reduction

    key = jax.random.PRNGKey(0)
    kx, k1, k2 = jax.random.split(key, 3)

    x = jax.random.normal(kx, (B, C, H, W), dtype=jnp.float32)
    # Deterministic synthetic weights (PyTorch Linear layout: (out, in)).
    w1 = jax.random.normal(k1, (C_red, C), dtype=jnp.float32) * 0.1
    w2 = jax.random.normal(k2, (C, C_red), dtype=jnp.float32) * 0.1

    out = squeeze_excitation(x, w1, w2)
    out = jax.block_until_ready(out)

    ref = _reference(x, w1, w2)
    assert out.shape == (B, C, H, W)
    assert jnp.allclose(out, ref, atol=1e-5, rtol=1e-5)

    print("KERNEL_OK")
</pallas_src>

<mosaic_0001>
module attributes {stable_mosaic.version = 11 : i64} {
  func.func @se_kernel(%arg0: i32, %arg1: memref<1x32x256xf32, #tpu.memory_space<vmem>>, %arg2: memref<2x32xf32, #tpu.memory_space<vmem>>, %arg3: memref<32x2xf32, #tpu.memory_space<vmem>>, %arg4: memref<1x32x256xf32, #tpu.memory_space<vmem>>) attributes {dimension_semantics = [#tpu.dimension_semantics<parallel>], iteration_bounds = array<i64: 2>, scalar_prefetch = 0 : i64, scratch_operands = 0 : i64, tpu.core_type = #tpu.core_type<tc>, window_params = [{transform_indices = @transform_0, window_bounds = array<i64: 1, 32, 256>}, {pipeline_mode = #tpu.pipeline_mode<synchronous>, transform_indices = @transform_1, window_bounds = array<i64: 2, 32>}, {pipeline_mode = #tpu.pipeline_mode<synchronous>, transform_indices = @transform_2, window_bounds = array<i64: 32, 2>}, {transform_indices = @transform_3, window_bounds = array<i64: 1, 32, 256>}]} {
    %c0 = arith.constant 0 : index
    %c0_0 = arith.constant 0 : index
    %c0_1 = arith.constant 0 : index
    %0 = vector.load %arg1[%c0, %c0_0, %c0_1] : memref<1x32x256xf32, #tpu.memory_space<vmem>>, vector<1x32x256xf32>
    %cst = arith.constant dense<0.000000e+00> : vector<1x32xf32>
    %1 = vector.multi_reduction <add>, %0, %cst [2] : vector<1x32x256xf32> to vector<1x32xf32>
    %cst_2 = arith.constant 3.906250e-03 : f32
    %2 = vector.broadcast %cst_2 : f32 to vector<1x32xf32>
    %3 = arith.mulf %1, %2 : vector<1x32xf32>
    %c0_3 = arith.constant 0 : index
    %c0_4 = arith.constant 0 : index
    %4 = vector.load %arg2[%c0_3, %c0_4] : memref<2x32xf32, #tpu.memory_space<vmem>>, vector<2x32xf32>
    "tpu.trace_start"() <{level = 10 : i32, message = "bc,rc->br"}> : () -> ()
    %cst_5 = arith.constant dense<0.000000e+00> : vector<1x2xf32>
    %5 = tpu.matmul %3, %4, %cst_5 {dimension_numbers = #tpu.dot_dimension_numbers<[1], [1], [0], [0], [0, 0, 1, 0], [], []>} : vector<1x32xf32>, vector<2x32xf32>, vector<1x2xf32> -> vector<1x2xf32>
    "tpu.trace_stop"() : () -> ()
    %cst_6 = arith.constant 0.000000e+00 : f32
    %6 = vector.broadcast %cst_6 : f32 to vector<1x2xf32>
    %7 = arith.maximumf %5, %6 : vector<1x2xf32>
    %c0_7 = arith.constant 0 : index
    %c0_8 = arith.constant 0 : index
    %8 = vector.load %arg3[%c0_7, %c0_8] : memref<32x2xf32, #tpu.memory_space<vmem>>, vector<32x2xf32>
    "tpu.trace_start"() <{level = 10 : i32, message = "br,cr->bc"}> : () -> ()
    %cst_9 = arith.constant dense<0.000000e+00> : vector<1x32xf32>
    %9 = tpu.matmul %7, %8, %cst_9 {dimension_numbers = #tpu.dot_dimension_numbers<[1], [1], [0], [0], [0, 0, 1, 0], [], []>} : vector<1x2xf32>, vector<32x2xf32>, vector<1x32xf32> -> vector<1x32xf32>
    "tpu.trace_stop"() : () -> ()
    %10 = arith.negf %9 : vector<1x32xf32>
    %11 = math.exp %10 : vector<1x32xf32>
    %cst_10 = arith.constant 1.000000e+00 : f32
    %12 = vector.broadcast %cst_10 : f32 to vector<1x32xf32>
    %13 = arith.addf %12, %11 : vector<1x32xf32>
    %14 = arith.divf %12, %13 : vector<1x32xf32>
    %c0_11 = arith.constant 0 : index
    %c0_12 = arith.constant 0 : index
    %c0_13 = arith.constant 0 : index
    %15 = vector.load %arg1[%c0_11, %c0_12, %c0_13] : memref<1x32x256xf32, #tpu.memory_space<vmem>>, vector<1x32x256xf32>
    %16 = vector.shape_cast %14 : vector<1x32xf32> to vector<1x32x1xf32>
    %17 = vector.broadcast %16 : vector<1x32x1xf32> to vector<1x32x256xf32>
    %18 = arith.mulf %15, %17 : vector<1x32x256xf32>
    %c0_14 = arith.constant 0 : index
    %c0_15 = arith.constant 0 : index
    %c0_16 = arith.constant 0 : index
    %19 = vector.load %arg4[%c0_14, %c0_15, %c0_16] : memref<1x32x256xf32, #tpu.memory_space<vmem>>, vector<1x32x256xf32>
    tpu.vector_store %arg4[%c0_14, %c0_15, %c0_16], %18 {strides = array<i32>} : memref<1x32x256xf32, #tpu.memory_space<vmem>>, vector<1x32x256xf32>,
    return
  }
  func.func @transform_0(%arg0: i32) -> (i32, i32, i32) {
    %c0_i32 = arith.constant 0 : i32
    %c0_i32_0 = arith.constant 0 : i32
    %c0_i32_1 = arith.constant 0 : i32
    return %arg0, %c0_i32, %c0_i32_0 : i32, i32, i32
  }
  func.func @transform_1(%arg0: i32) -> (i32, i32) {
    %c0_i32 = arith.constant 0 : i32
    %c0_i32_0 = arith.constant 0 : i32
    %c0_i32_1 = arith.constant 0 : i32
    return %c0_i32, %c0_i32_0 : i32, i32
  }
  func.func @transform_2(%arg0: i32) -> (i32, i32) {
    %c0_i32 = arith.constant 0 : i32
    %c0_i32_0 = arith.constant 0 : i32
    %c0_i32_1 = arith.constant 0 : i32
    return %c0_i32, %c0_i32_0 : i32, i32
  }
  func.func @transform_3(%arg0: i32) -> (i32, i32, i32) {
    %c0_i32 = arith.constant 0 : i32
    %c0_i32_0 = arith.constant 0 : i32
    %c0_i32_1 = arith.constant 0 : i32
    return %arg0, %c0_i32, %c0_i32_0 : i32, i32, i32
  }
}

</mosaic_0001>

<bundles_post_ra>
// kernel: tpu_custom_call.1
= control target key start
LH: loop header
LB: loop body
LE: loop exit
PB: predicated region body
PF: predicated region fallthrough
CT: control target
= control target key end

     0   :  { %8 = vsyncpa [#allocation3], 0  ;;  %s1005_s0 = inlined_call_operand.hbm [shape: f32[2,32,256], index: 0, kind: input, shape index: {}]   ;;  %s1006_s1 = inlined_call_operand.vmem [shape: f32[2,32], index: 1, kind: input, shape index: {}]   ;;  %s1007_s2 = inlined_call_operand.vmem [shape: f32[32,2], index: 2, kind: input, shape index: {}]   ;;  %s1008_s3 = inlined_call_operand.hbm [shape: f32[2,32,256], index: 3, kind: output, shape index: {}]  }
   0x1   :  { %10 = vsyncpa [#allocation3 + $0x1], 0 }
   0x2   :  { %11 = vsyncpa [#allocation4], 0 }
   0x3   :  { %13 = vsyncpa [#allocation4 + $0x1], 0  ;;  %s787_s12 = smov 0   ;;  %s789_s13 = smov 0  }
   0x4   :  { %s791_s14 = smov 0   ;;  %s793_s15 = smov 0  }
   0x5 LB: > { %s808_s16 = sadd.s32 4294967295, %s756_s15   ;;  %s548_s17 = sadd.s32 4294967294, %s756_s15   ;;  %s756_s15 = sphi %s793_s15, %s1021_s15   ;;  %s752_s14 = sphi %s791_s14, %s1020_s14   ;;  %s748_s13 = sphi %s789_s13, %s1019_s13   ;;  %s744_s12 = sphi %s787_s12, %s1018_s12  }
   0x6   : > { %s812_s18 = sadd.s32 1, %s756_s15   ;;  %s26_s19 = sadd.s32 1, %s752_s14 }
   0x7   : > { %s23_s20 = ssub.s32 %s756_s15, %s812_s18  ;;  %p33_p0 = scmp.ne.s32.totalorder %s752_s14, %s748_s13 }
   0x8   : > { %p24_p1 = scmp.eq.s32.totalorder %s23_s20, 0  ;;  %p34_p2 = scmp.eq.s32.totalorder %s756_s15, 0 }
   0x9   : > { %p39_p3 = scmp.ne.s32.totalorder %s748_s13, %s744_s12  ;;  %p40_p4 = scmp.eq.s32.totalorder %s808_s16, 0 }
   0xa   : > { %s824_s21 = scalar_select %p24_p1, %s752_s14, %s26_s19  }
   0xb   : > { %p826_p5 = por %p34_p2, %p33_p0  ;;  %p830_p6 = por %p40_p4, %p39_p3 }
   0xc   : > { %p105_p7 = scmp.eq.s32.totalorder %s808_s16, 1  ;;  %p111_p8 = scmp.eq.s32.totalorder %s548_s17, 1 }
   0xd   : > { %p615_p10 = scmp.lt.s32.totalorder %s756_s15, 2  ;;  %s137_s26 = sand.u32 1, %s752_s14  }
   0xe   : > { %p837_p11 = por %p105_p7, %p33_p0  ;;  %p841_p12 = por %p111_p8, %p39_p3 }
   0xf   : > { %s570_s27 = sshll.u32 %s756_s15, 10  ;;  %s551_s28 = sshll.u32 %s137_s26, 6 }
  0x10   : > { %s1012_s24 = scalar_select %p837_p11, 1, 0 }
  0x11   : > { %s1013_s25 = scalar_select %p841_p12, 1, 0 }
  0x12   : > { %s850_s4 = scalar_lea.hbm %s1005_s0, %s570_s27  ;;  %s141_s5 = scalar_lea.vmem [#allocation2], %s551_s28 }
  0x13   : > { %s148_s6 = sshll.u32 %s141_s5, 4  ;;  %p854_p13 = pnand %p615_p10, %p826_p5  ;;  %s858_s6 = int_to_ptr.vmem [resolvable:$true] %s148_s6 }
  0x14   : > { %s860_s8 = scalar_lea.sflag [#allocation3], %s137_s26  ;;  %s660_s9 = scalar_lea.hbm %s850_s4, 1024 }
  0x15   : > { %p661_p0 = scmp.ne.s32.totalorder %s850_s4, %s660_s9  ;;  %p662_p1 = pneg %p854_p13 }
  0x16   : > { %s665_s17 = scalar_lea.hbm %s1005_s0, 2048  ;;  %p666_p4 = scmp.lt.u32.totalorder %s850_s4, %s1005_s0 }
  0x17   : > { %p663_p2 = pnand %p662_p1, %p661_p0  ;;  %p667_p5 = scmp.lt.u32.totalorder %s665_s17, %s660_s9 }
  0x18   : > { %p669_p8 = scmp.lt.u32.totalorder %s660_s9, %s850_s4 }
  0x19   : > { %p664_p3 = pneg %p663_p2  ;;  %p668_p7 = por %p667_p5, %p666_p4 }
  0x1b   : > { %p670_p10 = por %p669_p8, %p668_p7 }
  0x1d   : > { %p671_p9 = pnand %p670_p10, %p664_p3 }
  0x1f   : > { %674 = shalt.err (!%p671_p9)
}
  0x20   : > { %s675_s22 = scalar_lea.vmem %s858_s6, 1024  ;;  %s758_s26 = smov [#allocation2]  }
  0x21   : > { %p676_p0 = scmp.ne.s32.totalorder %s858_s6, %s675_s22  ;;  %s680_s27 = sshll.u32 %s758_s26, 4  ;;  %s681_s27 = int_to_ptr.vmem [resolvable:$false] %s680_s27 }
  0x22   : > { %s682_s28 = scalar_lea.vmem %s681_s27, 2048  ;;  %p683_p11 = scmp.lt.s32.totalorder %s858_s6, %s681_s27 }
  0x23   : > { %p678_p2 = pnand %p676_p0, %p662_p1  ;;  %p684_p4 = scmp.lt.s32.totalorder %s682_s28, %s675_s22 }
  0x25   : > { %p679_p12 = pneg %p678_p2  ;;  %p685_p5 = por %p684_p4, %p683_p11 }
  0x27   : > { %p686_p7 = pnand %p685_p5, %p679_p12 }
  0x29   : > { %689 = shalt.err (!%p686_p7)
}
  0x2a   : > { %s759_s29 = smov 256   ;;  %s760_s30 = smov 16  }
  0x2b   : > { %610 = dma.hbm_to_vmem [thread:$0]  (!%p854_p13), %s850_s4, 1024, %s858_s6, %s860_s8, %s759_s29, %s759_s29, %s760_s30  }
  0x2c   : > { %p554_p9 = scmp.ge.s32.totalorder %s756_s15, 1  ;;  %p156_p1 = scmp.lt.s32.totalorder %s756_s15, 3 }
  0x2e   : > { %p157_p3 = pnand %p554_p9, %p156_p1 }
  0x2f   : > { %s891_s5 = sand.u32 (!%p157_p3), 1, %s748_s13  }
  0x30   : > { %160 = sbr.rel (%p157_p3) target bundleno = 806 (0x326), region = 32  ;;  %s555_s9 = sshll.u32 (!%p157_p3), %s891_s5, 6 }
  0x31   : > { %s163_s10 = scalar_lea.sflag (!%p157_p3), [#allocation3], %s891_s5  ;;  %s166_s11 = scalar_lea.vmem (!%p157_p3), [#allocation2], %s555_s9 }
  0x37   : > { %735 = dma.done.wait (%p830_p6), %s163_s10, 1024  }
  0x38   : > { %737 = vsyncadd (%p830_p6), %s163_s10, 4294966272  ;;  %v901_v0 = vld [vmem:[%s166_s11] sm:$0xff]  ;;  %v903_v1 = vld [vmem:[%s166_s11 + $0x8] sm:$0xff]  ;;  %v761_v12 = vmov 0.0   ;;  %vm245_vm0 = vcmask 261120   ;;  %vm762_vm1 = vmmov 0   ;;  %v218_v21 = vlaneseq }
  0x39   : > { %v905_v2 = vld [vmem:[%s166_s11 + $0x20] sm:$0xff]  ;;  %v197_v3 = vadd.f32 %v903_v1, %v901_v0  ;;  %v909_v4 = vld [vmem:[%s166_s11 + $0x28] sm:$0xff]  ;;  %v911_v5 = vld [vmem:[%s166_s11 + $0x10] sm:$0xff]  ;;  %579 = vmatprep.subr.mxu0 %v761_v12  ;;  %581 = vmatprep.mubr.msk.f32.mxu0 %vm762_vm1, %v761_v12  ;;  %vm326_vm2 = vcmask 15360   ;;  %v763_v16 = vmov 0.0|0.0   ;;  %vm229_vm4 = vcmask 130112  }
  0x3a   : > { %v913_v6 = vld [vmem:[%s166_s11 + $0x18] sm:$0xff]  ;;  %v203_v7 = vadd.f32 %v909_v4, %v905_v2  ;;  %v917_v8 = vld [vmem:[%s166_s11 + $0x30] sm:$0xff]  ;;  %v213_v13 = vld [vmem:[%s1006_s1] sm:$0x3]  ;;  %592 = vmatprep.mubr.msk.f32.mxu1 %vm762_vm1, %v761_v12  ;;  %595 = vmatprep.subr.bf16.mxu1 %v763_v16  ;;  %v219_v22 = vand.u32 127, %v218_v21  ;;  %v221_v23 = vshrl.u32 %v218_v21, 7 }
  0x3b   : > { %v919_v9 = vld [vmem:[%s166_s11 + $0x38] sm:$0xff]  ;;  %198 = vadd.xlane.f32.xlu0 %v197_v3  ;;  %v200_v10 = vadd.f32 %v913_v6, %v911_v5  ;;  %580 = vmatpush3.xpose.msk.msra.mxu0 %vm245_vm0, %v213_v13  ;;  %v322_v14 = vld [vmem:[%s1007_s2] sm:$0xff]  ;;  %v323_v15 = vld [vmem:[%s1007_s2 + $0x8] sm:$0xff]  ;;  %vm236_vm5 = vcmask 195712   ;;  %vm243_vm6 = vcmask 261312   ;;  %s188_s27 = scalar_lea.vmem [#allocation5], %s555_s9 }
  0x3c   : > { %204 = vadd.xlane.f32.xlu1 %v203_v7  ;;  %v206_v11 = vadd.f32 %v919_v9, %v917_v8  ;;  %v596_v17 = vpack.c.bf16 %v323_v15, %v322_v14  ;;  %vm597_vm3 = vmpackc.low %vm326_vm2, %vm326_vm2  ;;  %v324_v18 = vld [vmem:[%s1007_s2 + $0x10] sm:$0xff]  ;;  %v325_v19 = vld [vmem:[%s1007_s2 + $0x18] sm:$0xff]  ;;  %v224_v24 = vadd.s32 4294967288, %v219_v22  ;;  %v231_v26 = vadd.s32 4294967280, %v219_v22  ;;  %s475_s28 = sshll.u32 %s188_s27, 4  ;;  %s571_s29 = sshll.u32 %s808_s16, 10  ;;  %s954_s28 = int_to_ptr.vmem [resolvable:$true] %s475_s28 }
  0x3d   : > { %v600_v20 = vpack.c.bf16 %v325_v19, %v324_v18  ;;  %v238_v27 = vadd.s32 4294967272, %v219_v22  ;;  %v222_v29 = vsub.s32 %v219_v22, %v221_v23  ;;  %v428_v54 = vsub.s32 0, %v221_v23  ;;  %s959_s10 = scalar_lea.hbm %s1008_s3, %s571_s29  ;;  %s462_s16 = scalar_lea.sflag [#allocation4], %s891_s5 }
  0x3e   : > { %598 = vmatpush3.bf16.xpose.msk.msra.mxu1 %vm597_vm3, %v596_v17  ;;  %v227_v31 = vsub.s32 %v224_v24, %v221_v23  ;;  %v234_v32 = vsub.s32 %v231_v26, %v221_v23  ;;  %s690_s11 = scalar_lea.vmem %s954_s28, 1024  ;;  %p1015_p11 = scmp.ne.s32.totalorder %s1012_s24, 0 }
  0x3f   : > { %201 = vadd.xlane.f32.xlu0 %v200_v10  ;;  %599 = vmatprep.subr.bf16.mxu1 %v763_v16  ;;  %v241_v35 = vsub.s32 %v238_v27, %v221_v23  ;;  %p691_p6 = scmp.ne.s32.totalorder %s954_s28, %s690_s11  ;;  %s764_s23 = smov [#allocation5]  }
  0x40   : > { %207 = vadd.xlane.f32.xlu1 %v206_v11  ;;  %s694_s4 = sshll.u32 %s764_s23, 4  ;;  %s695_s4 = int_to_ptr.vmem [resolvable:$false] %s694_s4 }
  0x41   : > { %p692_p12 = pnand %p691_p6, %p1015_p11  ;;  %s696_s6 = scalar_lea.vmem %s695_s4, 2048 }
  0x42   : > { %p697_p8 = scmp.lt.s32.totalorder %s954_s28, %s695_s4  ;;  %p698_p10 = scmp.lt.s32.totalorder %s696_s6, %s690_s11 }
  0x43   : > { %p693_p13 = pneg %p692_p12 }
  0x44   : > { %p699_p0 = por %p698_p10, %p697_p8 }
  0x46   : > { %602 = vmatpush3.bf16.xpose.msk.msra.mxu1 %vm597_vm3, %v600_v20  ;;  %p700_p2 = pnand %p699_p0, %p693_p13 }
  0xc8   : > { %v199_v25 = vpop.xlane.xlu0 %198 }
  0xc9   : > { %v205_v28 = vpop.xlane.xlu1 %204  ;;  %v209_v30 = vmul.f32 0.00390625, %v199_v25 }
  0xca   : > { %v211_v33 = vmul.f32 0.00390625, %v205_v28 }
  0xcb   : > { %v223_v39 = vrot.slane %v209_v30, %v222_v29 }
  0xcc   : > { %v202_v34 = vpop.xlane.xlu0 %201  ;;  %v235_v41 = vrot.slane %v211_v33, %v234_v32 }
  0xcd   : > { %v210_v36 = vmul.f32 0.00390625, %v202_v34  ;;  %v208_v37 = vpop.xlane.xlu1 %207 }
  0xce   : > { %v212_v38 = vmul.f32 0.00390625, %v208_v37 }
  0xcf   : > { %v228_v40 = vrot.slane %v210_v36, %v227_v31 }
  0xd0   : > { %v242_v42 = vrot.slane %v212_v38, %v241_v35 }
  0xd1   : > { %v230_v43 = vsel %vm229_vm4, %v228_v40, %v223_v39 }
  0xd2   : > { %v237_v44 = vsel %vm236_vm5, %v235_v41, %v230_v43 }
  0xd3   : > { %v244_v45 = vsel %vm243_vm6, %v242_v42, %v237_v44 }
  0xd4   : > { %582 = vmatmul.mubr.msk.f32.vlgmr.msra.gmra.mrb[0].mxu0 %vm245_vm0, %v244_v45 }
 0x1a7   : > { %v317_v46 = vpop.f32.mrb[0].mxu0 }
 0x1a8   : > { %v321_v47 = vmax.f32 %v317_v46, 0.0  ;;  %v583_v48 = vpop.f32.mrb[1].mxu0 }
 0x1aa   : > { %593 = vmatmul.mubr.msk.f32.vlgmr.msra.gmra.mrb[0].mxu1 %vm326_vm2, %v321_v47 }
 0x27d   : > { %v408_v49 = vpop.f32.mrb[0].mxu1 }
 0x27e   : > { %v564_v50 = vmul.f32 -1.442695, %v408_v49  ;;  %v594_v51 = vpop.f32.mrb[1].mxu1 }
 0x280   : > { %656 = vpow2.f32 %v564_v50 }
 0x28a   : > { %v657_v52 = vpop.eup %656 }
 0x28b   : > { %v415_v53 = vadd.f32 1.0, %v657_v52 }
 0x28d   : > { %658 = vrcp.f32 %v415_v53 }
 0x297   : > { %v659_v55 = vpop.eup %658 }
 0x298   : > { %v429_v56 = vrot.slane %v659_v55, %v428_v54 }
 0x29a   : > { %435 = vbcast.lane.b32.xlu1 %v429_v56, 264  ;;  %431 = vbcast.lane.b32.xlu0 %v429_v56, 256 }
 0x29e   : > { %439 = vbcast.lane.b32.xlu1 %v429_v56, 272 }
 0x2a2   : > { %443 = vbcast.lane.b32.xlu1 %v429_v56, 280 }
 0x30c   : > { %v436_v57 = vpop.permute.xlu1 %435  ;;  %v432_v58 = vpop.permute.xlu0 %431 }
 0x30d   : > { %v447_v59 = vmul.f32 %v436_v57, %v911_v5  ;;  %v448_v60 = vmul.f32 %v436_v57, %v913_v6  ;;  %v445_v61 = vmul.f32 %v432_v58, %v901_v0  ;;  %v446_v62 = vmul.f32 %v432_v58, %v903_v1 }
 0x30f   : > { %455 = vst [vmem:[%s188_s27 + $0x10] sm:$0xff] %v447_v59  ;;  %456 = vst [vmem:[%s188_s27 + $0x18] sm:$0xff] %v448_v60 }
 0x310   : > { %453 = vst [vmem:[%s188_s27] sm:$0xff] %v445_v61  ;;  %454 = vst [vmem:[%s188_s27 + $0x8] sm:$0xff] %v446_v62  ;;  %v440_v63 = vpop.permute.xlu1 %439 }
 0x311   : > { %v449_v3 = vmul.f32 %v440_v63, %v905_v2  ;;  %v450_v5 = vmul.f32 %v440_v63, %v909_v4 }
 0x313   : > { %457 = vst [vmem:[%s188_s27 + $0x20] sm:$0xff] %v449_v3  ;;  %458 = vst [vmem:[%s188_s27 + $0x28] sm:$0xff] %v450_v5 }
 0x314   : > { %v444_v0 = vpop.permute.xlu1 %443 }
 0x315   : > { %v451_v1 = vmul.f32 %v444_v0, %v917_v8  ;;  %v452_v2 = vmul.f32 %v444_v0, %v919_v9 }
 0x317   : > { %459 = vst [vmem:[%s188_s27 + $0x30] sm:$0xff] %v451_v1  ;;  %460 = vst [vmem:[%s188_s27 + $0x38] sm:$0xff] %v452_v2 }
 0x318   : > { %703 = shalt.err (!%p700_p2)
}
 0x319   : > { %s704_s7 = scalar_lea.hbm %s959_s10, 1024  ;;  %s708_s19 = scalar_lea.hbm %s1008_s3, 2048 }
 0x31a   : > { %p705_p4 = scmp.ne.s32.totalorder %s959_s10, %s704_s7  ;;  %p709_p9 = scmp.lt.u32.totalorder %s959_s10, %s1008_s3 }
 0x31b   : > { %p710_p1 = scmp.lt.u32.totalorder %s708_s19, %s704_s7  ;;  %p712_p6 = scmp.lt.u32.totalorder %s704_s7, %s959_s10 }
 0x31c   : > { %p706_p5 = pnand %p705_p4, %p1015_p11 }
 0x31d   : > { %p711_p3 = por %p710_p1, %p709_p9 }
 0x31e   : > { %p707_p7 = pneg %p706_p5 }
 0x31f   : > { %p713_p12 = por %p712_p6, %p711_p3 }
 0x321   : > { %p714_p13 = pnand %p713_p12, %p707_p7 }
 0x323   : > { %717 = shalt.err (!%p714_p13)
}
 0x324   : > { %s765_s26 = smov 256   ;;  %s766_s27 = smov 16  }
 0x325   : > { %605 = dma.vmem_to_hbm [thread:$0]  (%p1015_p11), %s954_s28, 1024, %s959_s10, %s462_s16, %s765_s26, %s765_s26, %s766_s27  }
 0x326 PF: > { %s490_s29 = sand.u32 1, %s744_s12   ;;  %p1016_p8 = scmp.ne.s32.totalorder %s1013_s25, 0 }
 0x327   : > { %p1017_p10 = scmp.ge.s32.totalorder %s756_s15, 2  ;;  %s491_s30 = scalar_lea.sflag [#allocation4], %s490_s29 }
 0x329   : > { %p612_p0 = pnand %p1017_p10, %p1016_p8 }
 0x32b   : > { %739 = dma.done.wait (!%p612_p0), %s491_s30, 1024  }
 0x32c   : > { %741 = vsyncadd (!%p612_p0), %s491_s30, 4294966272  ;;  %p16_p2 = scmp.ge.s32.totalorder %s812_s18, 4   ;;  %s1018_s12 = smov %s748_s13 }
 0x32d   : > { %s1019_s13 = smov %s752_s14  ;;  %s1020_s14 = smov %s824_s21 }
 0x32e   : > { %s1021_s15 = smov %s812_s18  ;;  %18 = sbr.rel (!%p16_p2) target bundleno = 5 (0x5), region = 77 }
 0x335   :  { %496 = vsyncpa [#allocation3], 1 }
 0x336   :  { %498 = vsyncpa [#allocation3 + $0x1], 1 }
 0x337   :  { %499 = vsyncpa [#allocation4], 1 }
 0x338   :  { %501 = vsyncpa [#allocation4 + $0x1], 1 }

</bundles_post_ra>
